<compile_context>
chip_gen: v7x
topology: tpu7x:2x2x1
jax: 0.10.0
libtpu: 0.0.40
codegen_flags: <defaults>
</compile_context>

<pallas_src>
import functools

import jax
import jax.numpy as jnp
from jax.experimental import pallas as pl
from jax.experimental.pallas import tpu as pltpu


# ----------------------------- Pallas kernels --------------------------------
def _qnet_heads(x, w1, b1, w2, b2, wab, bab, kz):
    """2-layer ReLU MLP followed by the fused A/B head (one 2*KZ-wide matmul)."""
    h = jnp.dot(x, w1, preferred_element_type=jnp.float32) + b1
    h = jnp.maximum(h, 0.0)
    h = jnp.dot(h, w2, preferred_element_type=jnp.float32) + b2
    h = jnp.maximum(h, 0.0)                                          # (TM, H2)
    ab = jnp.dot(h, wab, preferred_element_type=jnp.float32) + bab   # (TM, 2*KZ)
    return ab[:, :kz], ab[:, kz:]                                    # lane-aligned split


def _sampler_kernel_sample(x_ref, eps_ref,
                           w1_ref, b1_ref, w2_ref, b2_ref, wab_ref, bab_ref,
                           z_ref, mu_ref, logvar_ref, *, nk, kz):
    A, B = _qnet_heads(x_ref[...], w1_ref[...], b1_ref[...], w2_ref[...],
                       b2_ref[...], wab_ref[...], bab_ref[...], kz)
    # repeat_interleave(eps, nk, dim=0) after the (N, nk*nz)->(N*nk, nz) view
    # == tiling eps nk times along the lane axis.
    eps_rep = jnp.concatenate([eps_ref[...]] * nk, axis=-1)          # (TM, KZ)
    z_ref[...] = (A * eps_rep + B).astype(z_ref.dtype)
    mu_ref[...] = B.astype(mu_ref.dtype)
    logvar_ref[...] = jnp.log(A * A + 1e-8).astype(logvar_ref.dtype)


def _sampler_kernel_mean(x_ref,
                         w1_ref, b1_ref, w2_ref, b2_ref, wab_ref, bab_ref,
                         z_ref, logvar_ref, *, kz):
    A, B = _qnet_heads(x_ref[...], w1_ref[...], b1_ref[...], w2_ref[...],
                       b2_ref[...], wab_ref[...], bab_ref[...], kz)
    z_ref[...] = B.astype(z_ref.dtype)            # mean path: z == mu == b
    logvar_ref[...] = jnp.log(A * A + 1e-8).astype(logvar_ref.dtype)


# ------------------------------ JAX wrapper ----------------------------------
def _round_up(x, m):
    return ((x + m - 1) // m) * m


def pack_sampler_params(params):
    """One-time packing: f32 casts, bias reshapes and q_A/q_b head fusion.
    Call once outside the per-step forward so these XLA ops (and the ~40KB of
    weight copies) do not re-run on every call."""
    f32 = jnp.float32
    return dict(
        w1=jnp.asarray(params["w1"], f32),
        b1=jnp.asarray(params["b1"], f32).reshape(1, -1),
        w2=jnp.asarray(params["w2"], f32),
        b2=jnp.asarray(params["b2"], f32).reshape(1, -1),
        wab=jnp.concatenate([jnp.asarray(params["wa"], f32),
                             jnp.asarray(params["wb"], f32)], axis=1),
        bab=jnp.concatenate([jnp.asarray(params["ba"], f32).reshape(1, -1),
                             jnp.asarray(params["bb"], f32).reshape(1, -1)], axis=1),
    )


def sampler_forward(agent_history, eps, packed, *, nk, nz, mean=False, tm=None,
                    out_dtype=jnp.float32):
    """agent_history: [N, D] f32.  eps: [N, nz] f32 (ignored when mean=True;
    for share_eps pass the same row broadcast to [N, nz]).
    Returns (z, mu, logvar), each [N*nk, nz] in `out_dtype`."""
    N, D = agent_history.shape
    H1 = packed["w1"].shape[1]
    H2 = packed["w2"].shape[1]
    KZ = nk * nz
    assert packed["wab"].shape == (H2, 2 * KZ) and packed["bab"].shape == (1, 2 * KZ)
    # The fused-head split A=ab[:, :KZ] / B=ab[:, KZ:] stays a free lane-aligned
    # slice only when nk*nz is a multiple of the 128-lane tile.
    assert KZ % 128 == 0, f"nk*nz={KZ} must be a multiple of 128"

    # Agent tile: big blocks for HBM streaming efficiency; default gives >=2
    # grid steps (v7x megacore) and caps at 1024 rows; multiple of 8 sublanes.
    if tm is None:
        tm = min(1024, _round_up(-(-N // 2), 8))
    tm = max(8, (int(tm) // 8) * 8)
    tm = min(tm, _round_up(N, 8))
    grid = (pl.cdiv(N, tm),)   # partial tail block handled by Pallas masking

    x = agent_history.astype(jnp.float32)

    row_spec = lambda shape: pl.BlockSpec(shape, lambda i: (i, 0))
    full_spec = lambda shape: pl.BlockSpec(shape, lambda i: (0, 0))

    weight_specs = [full_spec((D, H1)),  full_spec((1, H1)),          # q_mlp layer 1
                    full_spec((H1, H2)), full_spec((1, H2)),          # q_mlp layer 2
                    full_spec((H2, 2 * KZ)), full_spec((1, 2 * KZ))]  # fused heads
    weight_args = (packed["w1"], packed["b1"], packed["w2"], packed["b2"],
                   packed["wab"], packed["bab"])

    out_sds = jax.ShapeDtypeStruct((N, KZ), out_dtype)
    out_spec = pl.BlockSpec((tm, KZ), lambda i: (i, 0))
    cparams = pltpu.CompilerParams(dimension_semantics=("parallel",))

    if mean:
        z, logvar = pl.pallas_call(
            functools.partial(_sampler_kernel_mean, kz=KZ),
            out_shape=(out_sds, out_sds),
            grid_spec=pltpu.PrefetchScalarGridSpec(
                num_scalar_prefetch=0, grid=grid,
                in_specs=[row_spec((tm, D))] + weight_specs,
                out_specs=[out_spec, out_spec]),
            compiler_params=cparams,
        )(x, *weight_args)
        z = z.reshape(N * nk, nz)
        return z, z, logvar.reshape(N * nk, nz)      # mu aliases z on this path

    e = eps.astype(jnp.float32)
    z, mu, logvar = pl.pallas_call(
        functools.partial(_sampler_kernel_sample, nk=nk, kz=KZ),
        out_shape=(out_sds, out_sds, out_sds),
        grid_spec=pltpu.PrefetchScalarGridSpec(
            num_scalar_prefetch=0, grid=grid,
            in_specs=[row_spec((tm, D)), row_spec((tm, nz))] + weight_specs,
            out_specs=[out_spec, out_spec, out_spec]),
        compiler_params=cparams,
    )(x, e, *weight_args)
    # .view(-1, nz) — pure reshape glue (no row padding to strip anymore).
    return (z.reshape(N * nk, nz), mu.reshape(N * nk, nz),
            logvar.reshape(N * nk, nz))


# ------------------------------ reference ------------------------------------
def sampler_ref(agent_history, eps, params, *, nk, nz, mean=False):
    # Precision.HIGHEST so the reference matches the kernel's full-f32 MXU
    # matmuls (XLA's default TPU matmul precision is bf16 and would diverge).
    hp = jax.lax.Precision.HIGHEST
    h = jnp.maximum(jnp.dot(agent_history, params["w1"], precision=hp) + params["b1"], 0.0)
    h = jnp.maximum(jnp.dot(h, params["w2"], precision=hp) + params["b2"], 0.0)
    A = (jnp.dot(h, params["wa"], precision=hp) + params["ba"]).reshape(-1, nz)
    B = (jnp.dot(h, params["wb"], precision=hp) + params["bb"]).reshape(-1, nz)
    z = B if mean else A * jnp.repeat(eps, nk, axis=0) + B
    logvar = jnp.log(A * A + 1e-8)
    return z, B, logvar


# --------------------------------- main ---------------------------------------
if __name__ == "__main__":
    # Config consistent with the module's __init__:
    #   sample_k (nk) = 4, nz = 32, tf_model_dim = 32, qnet_mlp = [32, 32]
    nk, nz = 4, 32
    d_model = 32
    qnet_mlp = (32, 32)

    key = jax.random.PRNGKey(0)
    ks = jax.random.split(key, 12)

    def init_linear(kw, kb, fan_in, fan_out):
        lim = 1.0 / jnp.sqrt(fan_in)
        w = jax.random.uniform(kw, (fan_in, fan_out), jnp.float32, -lim, lim)
        b = jax.random.uniform(kb, (1, fan_out), jnp.float32, -lim, lim)
        return w, b

    w1, b1 = init_linear(ks[0], ks[1], d_model, qnet_mlp[0])
    w2, b2 = init_linear(ks[2], ks[3], qnet_mlp[0], qnet_mlp[1])
    wa, ba = init_linear(ks[4], ks[5], qnet_mlp[1], nk * nz)
    wb, bb = init_linear(ks[6], ks[7], qnet_mlp[1], nk * nz)
    params = dict(w1=w1, b1=b1, w2=w2, b2=b2, wa=wa, ba=ba, wb=wb, bb=bb)
    packed = pack_sampler_params(params)   # one-time head fusion / packing

    def check(name, got, want, atol, rtol):
        got = jnp.asarray(got, jnp.float32)
        want = jnp.asarray(want, jnp.float32)
        if not bool(jnp.allclose(got, want, atol=atol, rtol=rtol)):
            diff = float(jnp.max(jnp.abs(got - want)))
            raise AssertionError(f"{name}: max|diff|={diff:.3e} (atol={atol}, rtol={rtol})")

    # ---- case 1: small agent count (share_eps=False, mean=False) ------------
    agent_num = 8
    agent_history = jax.random.normal(ks[8], (agent_num, d_model), jnp.float32)
    eps = jax.random.normal(ks[9], (agent_num, nz), jnp.float32)

    fwd = jax.jit(functools.partial(sampler_forward, nk=nk, nz=nz, mean=False))
    z, mu, logvar = fwd(agent_history, eps, packed)
    jax.block_until_ready((z, mu, logvar))
    z_r, mu_r, lv_r = sampler_ref(agent_history, eps, params, nk=nk, nz=nz, mean=False)
    assert z.shape == (agent_num * nk, nz)
    check("case1 z", z, z_r, 5e-4, 5e-4)
    check("case1 mu", mu, mu_r, 5e-4, 5e-4)
    check("case1 logvar", logvar, lv_r, 1e-1, 1e-3)   # log(A^2+1e-8) is sensitive near A~0

    # ---- case 2: non-multiple agent count (partial tail block, >=2 grid steps)
    agent_num2 = 100
    agent_history2 = jax.random.normal(ks[10], (agent_num2, d_model), jnp.float32)
    eps2 = jax.random.normal(ks[11], (agent_num2, nz), jnp.float32)

    z2, mu2, lv2 = fwd(agent_history2, eps2, packed)
    jax.block_until_ready((z2, mu2, lv2))
    z2_r, mu2_r, lv2_r = sampler_ref(agent_history2, eps2, params, nk=nk, nz=nz, mean=False)
    assert z2.shape == (agent_num2 * nk, nz)
    check("case2 z", z2, z2_r, 5e-4, 5e-4)
    check("case2 mu", mu2, mu2_r, 5e-4, 5e-4)
    check("case2 logvar", lv2, lv2_r, 1e-1, 1e-3)

    # ---- case 3: mean=True path (only two output streams; mu aliases z) ------
    fwd_m = jax.jit(functools.partial(sampler_forward, nk=nk, nz=nz, mean=True))
    zm, mum, lvm = fwd_m(agent_history, eps, packed)
    jax.block_until_ready((zm, mum, lvm))
    zm_r, mum_r, lvm_r = sampler_ref(agent_history, eps, params, nk=nk, nz=nz, mean=True)
    check("case3 z", zm, zm_r, 5e-4, 5e-4)
    check("case3 mu", mum, mum_r, 5e-4, 5e-4)
    check("case3 logvar", lvm, lvm_r, 1e-1, 1e-3)

    # ---- case 4: bf16-output smoke (halves writeback bytes; gated by flag) ---
    fwd_bf = jax.jit(functools.partial(sampler_forward, nk=nk, nz=nz, mean=False,
                                       tm=64, out_dtype=jnp.bfloat16))
    zb, mub, lvb = fwd_bf(agent_history2, eps2, packed)
    jax.block_until_ready((zb, mub, lvb))
    assert zb.dtype == jnp.bfloat16 and zb.shape == (agent_num2 * nk, nz)
    check("case4 z(bf16)", zb, z2_r, 1e-1, 5e-2)
    check("case4 mu(bf16)", mub, mu2_r, 1e-1, 5e-2)

    print("KERNEL_OK")
</pallas_src>

<mosaic_0001>
module attributes {stable_mosaic.version = 11 : i64} {
  func.func @_sampler_kernel_sample(%arg0: i32, %arg1: memref<8x32xf32, #tpu.memory_space<vmem>>, %arg2: memref<8x32xf32, #tpu.memory_space<vmem>>, %arg3: memref<32x32xf32, #tpu.memory_space<vmem>>, %arg4: memref<1x32xf32, #tpu.memory_space<vmem>>, %arg5: memref<32x32xf32, #tpu.memory_space<vmem>>, %arg6: memref<1x32xf32, #tpu.memory_space<vmem>>, %arg7: memref<32x256xf32, #tpu.memory_space<vmem>>, %arg8: memref<1x256xf32, #tpu.memory_space<vmem>>, %arg9: memref<8x128xf32, #tpu.memory_space<vmem>>, %arg10: memref<8x128xf32, #tpu.memory_space<vmem>>, %arg11: memref<8x128xf32, #tpu.memory_space<vmem>>) attributes {dimension_semantics = [#tpu.dimension_semantics<parallel>], iteration_bounds = array<i64: 1>, scalar_prefetch = 0 : i64, scratch_operands = 0 : i64, tpu.core_type = #tpu.core_type<tc>, window_params = [{transform_indices = @transform_0, window_bounds = array<i64: 8, 32>}, {transform_indices = @transform_1, window_bounds = array<i64: 8, 32>}, {pipeline_mode = #tpu.pipeline_mode<synchronous>, transform_indices = @transform_2, window_bounds = array<i64: 32, 32>}, {pipeline_mode = #tpu.pipeline_mode<synchronous>, transform_indices = @transform_3, window_bounds = array<i64: 1, 32>}, {pipeline_mode = #tpu.pipeline_mode<synchronous>, transform_indices = @transform_4, window_bounds = array<i64: 32, 32>}, {pipeline_mode = #tpu.pipeline_mode<synchronous>, transform_indices = @transform_5, window_bounds = array<i64: 1, 32>}, {pipeline_mode = #tpu.pipeline_mode<synchronous>, transform_indices = @transform_6, window_bounds = array<i64: 32, 256>}, {pipeline_mode = #tpu.pipeline_mode<synchronous>, transform_indices = @transform_7, window_bounds = array<i64: 1, 256>}, {transform_indices = @transform_8, window_bounds = array<i64: 8, 128>}, {transform_indices = @transform_9, window_bounds = array<i64: 8, 128>}, {transform_indices = @transform_10, window_bounds = array<i64: 8, 128>}]} {
    %c0 = arith.constant 0 : index
    %c0_0 = arith.constant 0 : index
    %0 = vector.load %arg1[%c0, %c0_0] : memref<8x32xf32, #tpu.memory_space<vmem>>, vector<8x32xf32>
    %c0_1 = arith.constant 0 : index
    %c0_2 = arith.constant 0 : index
    %1 = vector.load %arg3[%c0_1, %c0_2] : memref<32x32xf32, #tpu.memory_space<vmem>>, vector<32x32xf32>
    %c0_3 = arith.constant 0 : index
    %c0_4 = arith.constant 0 : index
    %2 = vector.load %arg4[%c0_3, %c0_4] : memref<1x32xf32, #tpu.memory_space<vmem>>, vector<1x32xf32>
    %c0_5 = arith.constant 0 : index
    %c0_6 = arith.constant 0 : index
    %3 = vector.load %arg5[%c0_5, %c0_6] : memref<32x32xf32, #tpu.memory_space<vmem>>, vector<32x32xf32>
    %c0_7 = arith.constant 0 : index
    %c0_8 = arith.constant 0 : index
    %4 = vector.load %arg6[%c0_7, %c0_8] : memref<1x32xf32, #tpu.memory_space<vmem>>, vector<1x32xf32>
    %c0_9 = arith.constant 0 : index
    %c0_10 = arith.constant 0 : index
    %5 = vector.load %arg7[%c0_9, %c0_10] : memref<32x256xf32, #tpu.memory_space<vmem>>, vector<32x256xf32>
    %c0_11 = arith.constant 0 : index
    %c0_12 = arith.constant 0 : index
    %6 = vector.load %arg8[%c0_11, %c0_12] : memref<1x256xf32, #tpu.memory_space<vmem>>, vector<1x256xf32>
    %cst = arith.constant dense<0.000000e+00> : vector<8x32xf32>
    %7 = tpu.matmul %0, %1, %cst {dimension_numbers = #tpu.dot_dimension_numbers<[1], [0], [0], [1], [0, 0, 1, 1], [], []>} : vector<8x32xf32>, vector<32x32xf32>, vector<8x32xf32> -> vector<8x32xf32>
    %8 = vector.broadcast %2 : vector<1x32xf32> to vector<8x32xf32>
    %9 = arith.addf %7, %8 : vector<8x32xf32>
    %cst_13 = arith.constant 0.000000e+00 : f32
    %10 = vector.broadcast %cst_13 : f32 to vector<8x32xf32>
    %11 = arith.maximumf %9, %10 : vector<8x32xf32>
    %cst_14 = arith.constant dense<0.000000e+00> : vector<8x32xf32>
    %12 = tpu.matmul %11, %3, %cst_14 {dimension_numbers = #tpu.dot_dimension_numbers<[1], [0], [0], [1], [0, 0, 1, 1], [], []>} : vector<8x32xf32>, vector<32x32xf32>, vector<8x32xf32> -> vector<8x32xf32>
    %13 = vector.broadcast %4 : vector<1x32xf32> to vector<8x32xf32>
    %14 = arith.addf %12, %13 : vector<8x32xf32>
    %cst_15 = arith.constant 0.000000e+00 : f32
    %15 = vector.broadcast %cst_15 : f32 to vector<8x32xf32>
    %16 = arith.maximumf %14, %15 : vector<8x32xf32>
    %cst_16 = arith.constant dense<0.000000e+00> : vector<8x256xf32>
    %17 = tpu.matmul %16, %5, %cst_16 {dimension_numbers = #tpu.dot_dimension_numbers<[1], [0], [0], [1], [0, 0, 1, 1], [], []>} : vector<8x32xf32>, vector<32x256xf32>, vector<8x256xf32> -> vector<8x256xf32>
    %18 = vector.broadcast %6 : vector<1x256xf32> to vector<8x256xf32>
    %19 = arith.addf %17, %18 : vector<8x256xf32>
    %20 = vector.extract_strided_slice %19 {offsets = [0, 0], sizes = [8, 128], strides = [1, 1]} : vector<8x256xf32> to vector<8x128xf32>
    %21 = vector.extract_strided_slice %19 {offsets = [0, 128], sizes = [8, 128], strides = [1, 1]} : vector<8x256xf32> to vector<8x128xf32>
    %c0_17 = arith.constant 0 : index
    %c0_18 = arith.constant 0 : index
    %22 = vector.load %arg2[%c0_17, %c0_18] : memref<8x32xf32, #tpu.memory_space<vmem>>, vector<8x32xf32>
    %23 = tpu.concatenate %22, %22, %22, %22 in 1 : vector<8x32xf32>, vector<8x32xf32>, vector<8x32xf32>, vector<8x32xf32> -> vector<8x128xf32>
    %24 = arith.mulf %20, %23 : vector<8x128xf32>
    %25 = arith.addf %24, %21 : vector<8x128xf32>
    %c0_19 = arith.constant 0 : index
    %c0_20 = arith.constant 0 : index
    %26 = vector.load %arg9[%c0_19, %c0_20] : memref<8x128xf32, #tpu.memory_space<vmem>>, vector<8x128xf32>
    tpu.vector_store %arg9[%c0_19, %c0_20], %25 {strides = array<i32>} : memref<8x128xf32, #tpu.memory_space<vmem>>, vector<8x128xf32>,
    %c0_21 = arith.constant 0 : index
    %c0_22 = arith.constant 0 : index
    %27 = vector.load %arg10[%c0_21, %c0_22] : memref<8x128xf32, #tpu.memory_space<vmem>>, vector<8x128xf32>
    tpu.vector_store %arg10[%c0_21, %c0_22], %21 {strides = array<i32>} : memref<8x128xf32, #tpu.memory_space<vmem>>, vector<8x128xf32>,
    %28 = arith.mulf %20, %20 : vector<8x128xf32>
    %cst_23 = arith.constant 9.99999993E-9 : f32
    %29 = vector.broadcast %cst_23 : f32 to vector<8x128xf32>
    %30 = arith.addf %28, %29 : vector<8x128xf32>
    %31 = math.log %30 : vector<8x128xf32>
    %c0_24 = arith.constant 0 : index
    %c0_25 = arith.constant 0 : index
    %32 = vector.load %arg11[%c0_24, %c0_25] : memref<8x128xf32, #tpu.memory_space<vmem>>, vector<8x128xf32>
    tpu.vector_store %arg11[%c0_24, %c0_25], %31 {strides = array<i32>} : memref<8x128xf32, #tpu.memory_space<vmem>>, vector<8x128xf32>,
    return
  }
  func.func @transform_0(%arg0: i32) -> (i32, i32) {
    %c0_i32 = arith.constant 0 : i32
    %c0_i32_0 = arith.constant 0 : i32
    return %arg0, %c0_i32 : i32, i32
  }
  func.func @transform_1(%arg0: i32) -> (i32, i32) {
    %c0_i32 = arith.constant 0 : i32
    %c0_i32_0 = arith.constant 0 : i32
    return %arg0, %c0_i32 : i32, i32
  }
  func.func @transform_2(%arg0: i32) -> (i32, i32) {
    %c0_i32 = arith.constant 0 : i32
    %c0_i32_0 = arith.constant 0 : i32
    %c0_i32_1 = arith.constant 0 : i32
    return %c0_i32, %c0_i32_0 : i32, i32
  }
  func.func @transform_3(%arg0: i32) -> (i32, i32) {
    %c0_i32 = arith.constant 0 : i32
    %c0_i32_0 = arith.constant 0 : i32
    %c0_i32_1 = arith.constant 0 : i32
    return %c0_i32, %c0_i32_0 : i32, i32
  }
  func.func @transform_4(%arg0: i32) -> (i32, i32) {
    %c0_i32 = arith.constant 0 : i32
    %c0_i32_0 = arith.constant 0 : i32
    %c0_i32_1 = arith.constant 0 : i32
    return %c0_i32, %c0_i32_0 : i32, i32
  }
  func.func @transform_5(%arg0: i32) -> (i32, i32) {
    %c0_i32 = arith.constant 0 : i32
    %c0_i32_0 = arith.constant 0 : i32
    %c0_i32_1 = arith.constant 0 : i32
    return %c0_i32, %c0_i32_0 : i32, i32
  }
  func.func @transform_6(%arg0: i32) -> (i32, i32) {
    %c0_i32 = arith.constant 0 : i32
    %c0_i32_0 = arith.constant 0 : i32
    %c0_i32_1 = arith.constant 0 : i32
    return %c0_i32, %c0_i32_0 : i32, i32
  }
  func.func @transform_7(%arg0: i32) -> (i32, i32) {
    %c0_i32 = arith.constant 0 : i32
    %c0_i32_0 = arith.constant 0 : i32
    %c0_i32_1 = arith.constant 0 : i32
    return %c0_i32, %c0_i32_0 : i32, i32
  }
  func.func @transform_8(%arg0: i32) -> (i32, i32) {
    %c0_i32 = arith.constant 0 : i32
    %c0_i32_0 = arith.constant 0 : i32
    return %arg0, %c0_i32 : i32, i32
  }
  func.func @transform_9(%arg0: i32) -> (i32, i32) {
    %c0_i32 = arith.constant 0 : i32
    %c0_i32_0 = arith.constant 0 : i32
    return %arg0, %c0_i32 : i32, i32
  }
  func.func @transform_10(%arg0: i32) -> (i32, i32) {
    %c0_i32 = arith.constant 0 : i32
    %c0_i32_0 = arith.constant 0 : i32
    return %arg0, %c0_i32 : i32, i32
  }
}

</mosaic_0001>

<bundles_post_ra>
// kernel: sampler_forward.1
= control target key start
LH: loop header
LB: loop body
LE: loop exit
PB: predicated region body
PF: predicated region fallthrough
CT: control target
= control target key end

     0   :  { %16 = vsyncpa [#allocation3], 0  ;;  %s750_s0 = inlined_call_operand.hbm [shape: f32[8,32], index: 0, kind: input, shape index: {}]   ;;  %s751_s1 = inlined_call_operand.hbm [shape: f32[8,32], index: 1, kind: input, shape index: {}]   ;;  %s752_s2 = inlined_call_operand.hbm [shape: f32[32,32], index: 2, kind: input, shape index: {}]   ;;  %s753_s3 = inlined_call_operand.vmem [shape: f32[1,32], index: 3, kind: input, shape index: {}]   ;;  %s754_s4 = inlined_call_operand.hbm [shape: f32[32,32], index: 4, kind: input, shape index: {}]   ;;  %s755_s5 = inlined_call_operand.vmem [shape: f32[1,32], index: 5, kind: input, shape index: {}]   ;;  %s756_s6 = inlined_call_operand.hbm [shape: f32[32,256], index: 6, kind: input, shape index: {}]   ;;  %s757_s7 = inlined_call_operand.vmem [shape: f32[1,256], index: 7, kind: input, shape index: {}]   ;;  %s758_s8 = inlined_call_operand.vmem [shape: f32[8,128], index: 8, kind: output, shape index: {0}]   ;;  %s759_s9 = inlined_call_operand.vmem [shape: f32[8,128], index: 9, kind: output, shape index: {1}]   ;;  %s760_s10 = inlined_call_operand.vmem [shape: f32[8,128], index: 10, kind: output, shape index: {2}]  }
   0x1   :  { %17 = vsyncpa [#allocation5], 0 }
   0x2   :  { %18 = vsyncpa [#allocation8], 0  ;;  %s592_s13 = smov [#allocation4]   ;;  %s476_s17 = scalar_lea.hbm %s751_s1, 128 }
   0x3   :  { %s35_s14 = sshll.u32 %s592_s13, 4  ;;  %p477_p0 = scmp.ne.s32.totalorder %s751_s1, %s476_s17  ;;  %s36_s14 = int_to_ptr.vmem [resolvable:$true] %s35_s14 }
   0x4   :  { %p480_p1 = scmp.lt.u32.totalorder %s476_s17, %s751_s1 }
   0x6   :  { %p482_p2 = pnand %p480_p1, %p477_p0 }
   0x8   :  { %485 = shalt.err (!%p482_p2)
}
   0x9   :  { %s486_s22 = scalar_lea.vmem %s36_s14, 128  ;;  %p491_p4 = scmp.lt.s32.totalorder %s36_s14, %s36_s14 }
   0xa   :  { %p487_p3 = scmp.ne.s32.totalorder %s36_s14, %s486_s22  ;;  %p492_p5 = scmp.lt.s32.totalorder %s486_s22, %s486_s22 }
   0xc   :  { %p493_p6 = por %p492_p5, %p491_p4 }
   0xe   :  { %p494_p7 = pnand %p493_p6, %p487_p3 }
  0x10   :  { %497 = shalt.err (!%p494_p7)
}
  0x11   :  { %38 = dma.hbm_to_vmem [thread:$0]  %s751_s1, 128, %s36_s14, [#allocation5]  }
  0x12   :  { %s593_s25 = smov [#allocation7]   ;;  %s594_s27 = smov [#allocation2]  }
  0x13   :  { %s58_s26 = sshll.u32 %s593_s25, 4  ;;  %s25_s28 = sshll.u32 %s594_s27, 4  ;;  %s59_s26 = int_to_ptr.vmem [resolvable:$true] %s58_s26  ;;  %s26_s28 = int_to_ptr.vmem [resolvable:$true] %s25_s28 }
  0x14   :  { %s498_s11 = scalar_lea.hbm %s754_s4, 512 }
  0x15   :  { %p499_p8 = scmp.ne.s32.totalorder %s754_s4, %s498_s11  ;;  %p502_p9 = scmp.lt.u32.totalorder %s498_s11, %s754_s4 }
  0x17   :  { %p504_p10 = pnand %p502_p9, %p499_p8 }
  0x19   :  { %507 = shalt.err (!%p504_p10)
}
  0x1a   :  { %s508_s1 = scalar_lea.vmem %s59_s26, 512  ;;  %p513_p12 = scmp.lt.s32.totalorder %s59_s26, %s59_s26 }
  0x1b   :  { %p509_p11 = scmp.ne.s32.totalorder %s59_s26, %s508_s1  ;;  %p514_p13 = scmp.lt.s32.totalorder %s508_s1, %s508_s1 }
  0x1d   :  { %p515_p0 = por %p514_p13, %p513_p12 }
  0x1f   :  { %p516_p1 = pnand %p515_p0, %p509_p11 }
  0x21   :  { %519 = shalt.err (!%p516_p1)
}
  0x22   :  { %s595_s14 = smov 128   ;;  %s596_s17 = smov 8  }
  0x23   :  { %64 = dma.hbm_to_vmem [thread:$0]  %s754_s4, 512, %s59_s26, [#allocation8], %s595_s14, %s595_s14, %s596_s17  }
  0x24   :  { %s520_s22 = scalar_lea.hbm %s750_s0, 128 }
  0x25   :  { %p521_p2 = scmp.ne.s32.totalorder %s750_s0, %s520_s22  ;;  %p524_p3 = scmp.lt.u32.totalorder %s520_s22, %s750_s0 }
  0x27   :  { %p526_p4 = pnand %p524_p3, %p521_p2 }
  0x29   :  { %529 = shalt.err (!%p526_p4)
}
  0x2a   :  { %s530_s29 = scalar_lea.vmem %s26_s28, 128  ;;  %p535_p6 = scmp.lt.s32.totalorder %s26_s28, %s26_s28 }
  0x2b   :  { %p531_p5 = scmp.ne.s32.totalorder %s26_s28, %s530_s29  ;;  %p536_p7 = scmp.lt.s32.totalorder %s530_s29, %s530_s29 }
  0x2d   :  { %p537_p8 = por %p536_p7, %p535_p6 }
  0x2f   :  { %p538_p9 = pnand %p537_p8, %p531_p5 }
  0x31   :  { %541 = shalt.err (!%p538_p9)
}
  0x32   :  { %28 = dma.hbm_to_vmem [thread:$0]  %s750_s0, 128, %s26_s28, [#allocation3]  }
  0x33   :  { %s597_s30 = smov [#allocation6]   ;;  %s598_s12 = smov [#allocation9]  }
  0x34   :  { %s44_s11 = sshll.u32 %s597_s30, 4  ;;  %s72_s13 = sshll.u32 %s598_s12, 4  ;;  %s45_s11 = int_to_ptr.vmem [resolvable:$true] %s44_s11  ;;  %s73_s13 = int_to_ptr.vmem [resolvable:$true] %s72_s13 }
  0x35   :  { %s542_s1 = scalar_lea.hbm %s752_s2, 512 }
  0x36   :  { %p543_p10 = scmp.ne.s32.totalorder %s752_s2, %s542_s1  ;;  %p546_p11 = scmp.lt.u32.totalorder %s542_s1, %s752_s2 }
  0x38   :  { %p548_p12 = pnand %p546_p11, %p543_p10 }
  0x3a   :  { %551 = shalt.err (!%p548_p12)
}
  0x3b   :  { %s552_s0 = scalar_lea.vmem %s45_s11, 512  ;;  %p557_p0 = scmp.lt.s32.totalorder %s45_s11, %s45_s11 }
  0x3c   :  { %p553_p13 = scmp.ne.s32.totalorder %s45_s11, %s552_s0  ;;  %p558_p1 = scmp.lt.s32.totalorder %s552_s0, %s552_s0 }
  0x3e   :  { %p559_p2 = por %p558_p1, %p557_p0 }
  0x40   :  { %p560_p3 = pnand %p559_p2, %p553_p13 }
  0x42   :  { %563 = shalt.err (!%p560_p3)
}
  0x43   :  { %50 = dma.hbm_to_vmem [thread:$0]  %s752_s2, 512, %s45_s11, [#allocation5], %s595_s14, %s595_s14, %s596_s17  }
  0x44   :  { %s564_s25 = scalar_lea.hbm %s756_s6, 1024 }
  0x45   :  { %p565_p4 = scmp.ne.s32.totalorder %s756_s6, %s564_s25  ;;  %p568_p5 = scmp.lt.u32.totalorder %s564_s25, %s756_s6 }
  0x47   :  { %p570_p6 = pnand %p568_p5, %p565_p4 }
  0x49   :  { %573 = shalt.err (!%p570_p6)
}
  0x4a   :  { %s574_s30 = scalar_lea.vmem %s73_s13, 1024  ;;  %p579_p8 = scmp.lt.s32.totalorder %s73_s13, %s73_s13 }
  0x4b   :  { %p575_p7 = scmp.ne.s32.totalorder %s73_s13, %s574_s30  ;;  %p580_p9 = scmp.lt.s32.totalorder %s574_s30, %s574_s30 }
  0x4d   :  { %p581_p10 = por %p580_p9, %p579_p8 }
  0x4f   :  { %p582_p11 = pnand %p581_p10, %p575_p7 }
  0x51   :  { %585 = shalt.err (!%p582_p11)
}
  0x52   :  { %s599_s2 = smov 256   ;;  %s600_s14 = smov 16  }
  0x53   :  { %78 = dma.hbm_to_vmem [thread:$0]  %s756_s6, 1024, %s73_s13, [#allocation8], %s599_s2, %s599_s2, %s600_s14  }
  0x54   :  { %586 = dma.done.wait [#allocation3], 128  }
  0x55   :  { %587 = vsyncadd [#allocation3], 4294967168 }
  0x56   :  { %588 = dma.done.wait [#allocation5], 640  }
  0x57   :  { %589 = vsyncadd [#allocation5], 4294966656 }
  0x58   :  { %590 = dma.done.wait [#allocation8], 1536  }
  0x59   :  { %591 = vsyncadd [#allocation8], 4294965760  ;;  %v601_v0 = vmov 0.0|0.0   ;;  %vm602_vm0 = vmmov 0   ;;  %v603_v1 = vmov 0.0   ;;  %v97_v2 = vld [vmem:[#allocation6] sm:$0xff]  ;;  %v278_v38 = vlaneseq }
  0x5a   :  { %439 = vmatprep.subr.bf16.mxu0 %v601_v0  ;;  %425 = vmatprep.mubr.msk.f32.mxu0 %vm602_vm0, %v603_v1  ;;  %v98_v3 = vld [vmem:[#allocation6 + $0x8] sm:$0xff]  ;;  %v99_v4 = vld [vmem:[#allocation6 + $0x10] sm:$0xff]  ;;  %v100_v6 = vld [vmem:[#allocation6 + $0x18] sm:$0xff]  ;;  %vm122_vm1 = vcmask 261120   ;;  %s604_s13 = smov 32   ;;  %s605_s15 = smov 96  }
  0x5b   :  { %445 = vmatprep.subr.bf16.mxu1 %v601_v0  ;;  %436 = vmatprep.mubr.msk.f32.mxu1 %vm602_vm0, %v603_v1  ;;  %v440_v5 = vpack.c.bf16 %v98_v3, %v97_v2  ;;  %v102_v7 = vld [vmem:[#allocation7] sm:$0xff]  ;;  %v103_v8 = vld [vmem:[#allocation7 + $0x8] sm:$0xff]  ;;  %v443_v9 = vpack.c.bf16 %v100_v6, %v99_v4  ;;  %v96_v11 = vld [vmem:[#allocation2] sm:$0xff]  ;;  %v279_v40 = vshrl.u32 %v278_v38, 7  ;;  %vm374_vm2 = vcmask 523264  }
  0x5c   :  { %v446_v10 = vpack.c.bf16 %v103_v8, %v102_v7  ;;  %v104_v12 = vld [vmem:[#allocation7 + $0x10] sm:$0xff]  ;;  %v105_v13 = vld [vmem:[#allocation7 + $0x18] sm:$0xff]  ;;  %v108_v15 = vld [vmem:[#allocation9 + $0x8] sm:$0xff]  ;;  %vm376_vm3 = vcmask 785408  }
  0x5d   :  { %441 = vmatpush3.bf16.msra.mxu0 %v440_v5  ;;  %v449_v14 = vpack.c.bf16 %v105_v13, %v104_v12  ;;  %v110_v16 = vld [vmem:[#allocation9 + $0x18] sm:$0xff]  ;;  %v107_v17 = vld [vmem:[#allocation9] sm:$0xff]  ;;  %v109_v19 = vld [vmem:[#allocation9 + $0x10] sm:$0xff]  ;;  %v280_v41 = vsub.s32 0, %v279_v40  ;;  %v284_v45 = vsub.s32 1, %v279_v40 }
  0x5e   :  { %442 = vmatprep.subr.bf16.mxu0 %v601_v0  ;;  %447 = vmatpush3.bf16.msra.mxu1 %v446_v10  ;;  %v451_v18 = vpack.c.bf16 %v110_v16, %v108_v15  ;;  %v453_v20 = vpack.c.bf16 %v109_v19, %v107_v17  ;;  %v402_v21 = vld [vmem:[%s753_s3] ss:$0 sm:$0xff]  ;;  %v112_v26 = vld [vmem:[#allocation9 + $0x28] sm:$0xff]  ;;  %v114_v27 = vld [vmem:[#allocation9 + $0x38] sm:$0xff]  ;;  %s606_s3 = smov 64  }
  0x5f   :  { %448 = vmatprep.subr.bf16.mxu1 %v601_v0  ;;  %v455_v28 = vpack.c.bf16 %v114_v27, %v112_v26  ;;  %v111_v29 = vld [vmem:[#allocation9 + $0x20] sm:$0xff]  ;;  %v113_v30 = vld [vmem:[#allocation9 + $0x30] sm:$0xff]  ;;  %v362_v32 = vld [vmem:[#allocation4] sm:$0xff] }
  0x60   :  { %v457_v31 = vpack.c.bf16 %v113_v30, %v111_v29  ;;  %364 = vrot.lane.b32.xlu0 %v362_v32, %s604_s13  ;;  %370 = vrot.lane.b32.xlu1 %v362_v32, %s605_s15  ;;  %v404_v33 = vld [vmem:[%s755_s5] ss:$0 sm:$0xff] }
  0x61   :  { %444 = vmatpush3.bf16.msra.mxu0 %v443_v9  ;;  %v115_v44 = vld [vmem:[%s757_s7] sm:$0x3] }
  0x62   :  { %450 = vmatpush3.bf16.msra.mxu1 %v449_v14  ;;  %452 = vmatprep.subr.bf16.mxu0 %v451_v18  ;;  %v281_v47 = vrot.slane %v115_v44, %v280_v41  ;;  %v285_v49 = vrot.slane %v115_v44, %v284_v45 }
  0x64   :  { %426 = vmatmul.mubr.msk.f32.vlgmr.msra.gmra.mrb[0].mxu0 %vm122_vm1, %v96_v11  ;;  %367 = vrot.lane.b32.xlu0 %v362_v32, %s606_s3 }
  0x65   :  { %355 = vmatprep.mubr.f32.mxu0 %v603_v1  ;;  %454 = vmatpush1.bf16.msra.mxu0 %v453_v20 }
  0x66   :  { %456 = vmatprep.subr.bf16.mxu0 %v455_v28 }
  0x69   :  { %458 = vmatpush1.bf16.msra.mxu0 %v457_v31 }
  0xd2   :  { %v365_v39 = vpop.permute.xlu0 %364  ;;  %v371_v48 = vpop.permute.xlu1 %370 }
  0xd3   :  { %v373_v42 = vsel %vm122_vm1, %v362_v32, %v365_v39 }
  0xd6   :  { %v368_v43 = vpop.permute.xlu0 %367 }
  0xd7   :  { %v375_v46 = vsel %vm374_vm2, %v373_v42, %v368_v43 }
  0xd8   :  { %v377_v51 = vsel %vm376_vm3, %v375_v46, %v371_v48 }
 0x137   :  { %v192_v22 = vpop.f32.mrb[0].mxu0 }
 0x138   :  { %v193_v23 = vadd.f32 %v402_v21, %v192_v22  ;;  %v427_v24 = vpop.f32.mrb[1].mxu0 }
 0x13a   :  { %v196_v25 = vmax.f32 %v193_v23, 0.0 }
 0x13c   :  { %437 = vmatmul.mubr.msk.f32.vlgmr.msra.gmra.mrb[0].mxu1 %vm122_vm1, %v196_v25 }
 0x20f   :  { %v272_v34 = vpop.f32.mrb[0].mxu1 }
 0x210   :  { %v273_v35 = vadd.f32 %v404_v33, %v272_v34  ;;  %v438_v36 = vpop.f32.mrb[1].mxu1 }
 0x212   :  { %v276_v37 = vmax.f32 %v273_v35, 0.0 }
 0x214   :  { %406 = vmatmul.mubr.msk.f32.vlgmr.msra.gmra.mrb[2].mxu0 %vm122_vm1, %v276_v37 }
 0x2e7   :  { %v357_v50 = vpop.f32.mrb[2].mxu0 }
 0x2e8   :  { %v358_v52 = vadd.f32 %v357_v50, %v281_v47  ;;  %v359_v53 = vpop.f32.mrb[3].mxu0 }
 0x2e9   :  { %v360_v54 = vadd.f32 %v359_v53, %v285_v49 }
 0x2ea   :  { %v382_v55 = vmul.f32 %v358_v52, %v358_v52  ;;  %v378_v56 = vmul.f32 %v377_v51, %v358_v52 }
 0x2eb   :  { %381 = vst [vmem:[%s759_s9] sm:$0xff] %v360_v54 }
 0x2ec   :  { %v383_v57 = vadd.f32 1e-08, %v382_v55  ;;  %v379_v58 = vadd.f32 %v378_v56, %v360_v54 }
 0x2ee   :  { %474 = vlog2.f32 %v383_v57  ;;  %380 = vst [vmem:[%s758_s8] sm:$0xff] %v379_v58 }
 0x2f8   :  { %v475_v59 = vpop.eup %474 }
 0x2f9   :  { %v385_v60 = vmul.f32 0.6931472, %v475_v59 }
 0x2fb   :  { %386 = vst [vmem:[%s760_s10] sm:$0xff] %v385_v60 }
 0x2fc   :  { %399 = vsyncpa [#allocation3], 1 }
 0x2fd   :  { %400 = vsyncpa [#allocation5], 1 }
 0x2fe   :  { %401 = vsyncpa [#allocation8], 1 }

</bundles_post_ra>
